<compile_context>
chip_gen: v7x
topology: tpu7x:2x2x1
jax: 0.10.0
libtpu: 0.0.40
codegen_flags: <defaults>
</compile_context>

<pallas_src>
import functools

import jax
import jax.numpy as jnp
from jax import lax
from jax.experimental import pallas as pl
from jax.experimental.pallas import tpu as pltpu


# ---------------------------------------------------------------------------
# Kernel
# ---------------------------------------------------------------------------
def _affine_grid_sample_kernel(theta_ref, x_ref, o_ref, *, H, W, T, gather_h,
                               gather_dtype):
    """theta_ref: SMEM (N, 6); x_ref: VMEM (1, C, D0, D1); o_ref: VMEM (1, C, T).

    (D0, D1) == (W, H) when gather_h (x pre-transposed in the wrapper, MXU
    contracts over H), else (H, W) (MXU contracts over W).
    """
    n = pl.program_id(0)
    t = pl.program_id(1)
    C = x_ref.shape[1]

    t00 = theta_ref[n, 0]
    t01 = theta_ref[n, 1]
    t02 = theta_ref[n, 2]
    t10 = theta_ref[n, 3]
    t11 = theta_ref[n, 4]
    t12 = theta_ref[n, 5]

    # Global output-pixel ids for this tile, along the lane axis: (1, T).
    p = lax.broadcasted_iota(jnp.int32, (1, T), 1) + t * T
    if (W & (W - 1)) == 0:  # power-of-two W: shift/mask instead of div/mod
        shift = W.bit_length() - 1
        i_row = (p >> shift).astype(jnp.float32)
        j_col = (p & (W - 1)).astype(jnp.float32)
    else:
        i_row = (p // W).astype(jnp.float32)
        j_col = (p % W).astype(jnp.float32)

    # F.affine_grid base coordinates, align_corners=False.
    xs = (2.0 * j_col + 1.0) / W - 1.0
    ys = (2.0 * i_row + 1.0) / H - 1.0
    gx = t00 * xs + t01 * ys + t02
    gy = t10 * xs + t11 * ys + t12

    # F.grid_sample un-normalization, align_corners=False.
    ix = ((gx + 1.0) * W - 1.0) * 0.5
    iy = ((gy + 1.0) * H - 1.0) * 0.5

    x0f = jnp.floor(ix)
    y0f = jnp.floor(iy)
    wx1 = ix - x0f
    wx0 = 1.0 - wx1
    wy1 = iy - y0f
    wy0 = 1.0 - wy1
    x0 = x0f.astype(jnp.int32)
    x1 = x0 + 1
    y0 = y0f.astype(jnp.int32)
    y1 = y0 + 1

    # padding_mode='zeros': out-of-range corners get zero weight; indices are
    # clamped in-range (the zeroed weight kills the clamped contribution).
    wx0 = jnp.where((x0 >= 0) & (x0 < W), wx0, 0.0)
    wx1 = jnp.where((x1 >= 0) & (x1 < W), wx1, 0.0)
    wy0 = jnp.where((y0 >= 0) & (y0 < H), wy0, 0.0)
    wy1 = jnp.where((y1 >= 0) & (y1 < H), wy1, 0.0)
    x0 = jnp.clip(x0, 0, W - 1)
    x1 = jnp.clip(x1, 0, W - 1)
    y0 = jnp.clip(y0, 0, H - 1)
    y1 = jnp.clip(y1, 0, H - 1)

    # Separable selector matrices (two non-zeros per column), lane axis = T.
    w_iota = lax.broadcasted_iota(jnp.int32, (W, T), 0)
    h_iota = lax.broadcasted_iota(jnp.int32, (H, T), 0)
    wx_sel = (jnp.where(w_iota == x0, wx0, 0.0)
              + jnp.where(w_iota == x1, wx1, 0.0))          # (W, T)
    wy_sel = (jnp.where(h_iota == y0, wy0, 0.0)
              + jnp.where(h_iota == y1, wy1, 0.0))          # (H, T)

    if gather_h:
        D0, D1 = W, H
        sel_mat, sel_red = wy_sel, wx_sel                   # (H, T), (W, T)
    else:
        D0, D1 = H, W
        sel_mat, sel_red = wx_sel, wy_sel                   # (W, T), (H, T)
    sel_mat = sel_mat.astype(gather_dtype)

    if D0 % 8 == 0:
        # Channel-stacked gather: a single MXU matmul with M = C*D0.
        xm = x_ref[0].reshape(C * D0, D1).astype(gather_dtype)
        u = jnp.dot(xm, sel_mat, preferred_element_type=jnp.float32)
        u = u.reshape(C, D0, T)
        out = jnp.sum(u * sel_red[None, :, :], axis=1)      # (C, T)
        o_ref[0] = out.astype(o_ref.dtype)
    else:
        # Fallback for layout-unfriendly D0: per-channel matmul, direct stores.
        for c in range(C):  # C is small and static -> unrolled
            xc = x_ref[0, c].astype(gather_dtype)                        # (D0, D1)
            u = jnp.dot(xc, sel_mat, preferred_element_type=jnp.float32)  # (D0, T)
            row = jnp.sum(u * sel_red, axis=0, keepdims=True)             # (1, T)
            o_ref[0, c:c + 1, :] = row.astype(o_ref.dtype)


# ---------------------------------------------------------------------------
# Tiling / VMEM budgeting
# ---------------------------------------------------------------------------
def _round_up(v, m):
    return (v + m - 1) // m * m


def _vmem_capacity_bytes():
    try:
        info = pltpu.get_tpu_info()
        for attr in ("vmem_capacity_bytes", "vmem_size_bytes", "vmem_bytes"):
            v = getattr(info, attr, None)
            if v:
                return int(v)
    except Exception:
        pass
    return 64 << 20  # conservative default (v7x per-TensorCore VMEM)


def _vmem_per_tile(H, W, C, itemsize):
    """(bytes that scale with T, fixed bytes) of in-kernel VMEM usage."""
    per_t = (8 * (H + W)              # f32 selectors + int32 iotas
             + 4 * C * min(H, W)      # stage-1 matmul result u (f32)
             + 4 * C * itemsize)      # output block (double-buffered-ish)
    per_t = per_t * 5 // 4            # 25% slack for small (1,T) temporaries
    fixed = 2 * C * H * W * itemsize + (4 << 20)   # dbl-buffered input + slack
    return per_t, fixed


def _pick_tile_out(HW, H, W, C, itemsize, budget):
    """Lane-aligned (multiple of 128) output-pixel tile that fits `budget`."""
    per_t, fixed = _vmem_per_tile(H, W, C, itemsize)
    cap = max(128, (budget - fixed) // max(per_t, 1))
    cap = max(128, (cap // 128) * 128)
    cap = min(cap, 4096)
    T = min(_round_up(HW, 128), cap)
    return T, _round_up(HW, T)


# ---------------------------------------------------------------------------
# Wrapper
# ---------------------------------------------------------------------------
def affine_transform_forward(x, theta, *, tile_out=None, gather_dtype=None):
    """x: (N, C, H, W), theta: (N, 2, 3) -> (N, C, H, W)."""
    N, C, H, W = x.shape
    HW = H * W
    itemsize = jnp.dtype(x.dtype).itemsize

    if gather_dtype is None:
        # bf16 gather only when the input is already bf16 (keeps f32 tolerances).
        gather_dtype = jnp.bfloat16 if x.dtype == jnp.bfloat16 else jnp.float32

    phys = _vmem_capacity_bytes()
    budget = min(phys // 2, 64 << 20)
    if tile_out is None:
        T, HW_pad = _pick_tile_out(HW, H, W, C, itemsize, budget)
    else:
        assert tile_out % 128 == 0, "tile_out must be a multiple of 128"
        T = tile_out
        HW_pad = _round_up(HW, T)
    nt = HW_pad // T

    per_t, fixed = _vmem_per_tile(H, W, C, itemsize)
    needed = fixed + per_t * T
    vmem_limit = int(min(phys * 9 // 10, max(2 * needed, 32 << 20)))

    # Put the larger spatial dim on the MXU contraction axis.
    gather_h = H > W
    x_in = jnp.swapaxes(x, 2, 3) if gather_h else x   # (N, C, D0, D1)
    D0, D1 = x_in.shape[2], x_in.shape[3]

    theta_flat = theta.reshape(N, 6).astype(jnp.float32)

    kernel = functools.partial(_affine_grid_sample_kernel, H=H, W=W, T=T,
                               gather_h=gather_h, gather_dtype=gather_dtype)

    # MXU gather flops + selector construction work (advisory only).
    flops = int(2 * N * C * H * W * HW_pad + 12 * N * HW_pad * (H + W))
    bytes_accessed = int((x.size + N * C * HW_pad) * itemsize
                         + theta_flat.size * 4)

    out = pl.pallas_call(
        kernel,
        out_shape=jax.ShapeDtypeStruct((N, C, HW_pad), x.dtype),
        grid_spec=pltpu.PrefetchScalarGridSpec(
            num_scalar_prefetch=1,
            grid=(N, nt),
            in_specs=[
                pl.BlockSpec((1, C, D0, D1), lambda n, t, _theta: (n, 0, 0, 0)),
            ],
            out_specs=pl.BlockSpec((1, C, T), lambda n, t, _theta: (n, 0, t)),
        ),
        compiler_params=pltpu.CompilerParams(
            dimension_semantics=("parallel", "arbitrary"),
            vmem_limit_bytes=vmem_limit),
        cost_estimate=pl.CostEstimate(
            flops=flops, transcendentals=0, bytes_accessed=bytes_accessed),
    )(theta_flat, x_in)
    return out[:, :, :HW].reshape(N, C, H, W)


# ---------------------------------------------------------------------------
# Pure-JAX reference (affine_grid + grid_sample, bilinear / zeros / ac=False)
# ---------------------------------------------------------------------------
def _ref_forward(x, theta):
    N, C, H, W = x.shape
    ys = (2.0 * jnp.arange(H, dtype=jnp.float32) + 1.0) / H - 1.0
    xs = (2.0 * jnp.arange(W, dtype=jnp.float32) + 1.0) / W - 1.0
    X, Y = jnp.meshgrid(xs, ys)                      # (H, W)
    base = jnp.stack([X, Y, jnp.ones_like(X)], -1)   # (H, W, 3)
    grid = jnp.einsum('nab,hwb->nhwa', theta, base)  # (N, H, W, 2)
    gx, gy = grid[..., 0], grid[..., 1]
    ix = ((gx + 1.0) * W - 1.0) * 0.5
    iy = ((gy + 1.0) * H - 1.0) * 0.5
    x0 = jnp.floor(ix); x1 = x0 + 1.0
    y0 = jnp.floor(iy); y1 = y0 + 1.0
    wx1 = ix - x0; wx0 = 1.0 - wx1
    wy1 = iy - y0; wy0 = 1.0 - wy1

    def gather(yc, xc):
        valid = (xc >= 0) & (xc < W) & (yc >= 0) & (yc < H)
        xi = jnp.clip(xc, 0, W - 1).astype(jnp.int32)
        yi = jnp.clip(yc, 0, H - 1).astype(jnp.int32)
        v = x[jnp.arange(N)[:, None, None, None],
              jnp.arange(C)[None, :, None, None],
              yi[:, None], xi[:, None]]
        return v * valid[:, None].astype(x.dtype)

    return (gather(y0, x0) * (wy0 * wx0)[:, None]
            + gather(y0, x1) * (wy0 * wx1)[:, None]
            + gather(y1, x0) * (wy1 * wx0)[:, None]
            + gather(y1, x1) * (wy1 * wx1)[:, None])


def _identity_theta(n):
    th = jnp.zeros((n, 2, 3), jnp.float32)
    return th.at[:, 0, 0].set(1.0).at[:, 1, 1].set(1.0)


if __name__ == "__main__":
    # --- test 1: original small shape, identity (exact) + random affine ---
    N, C, H, W = 2, 4, 16, 16
    x = jax.random.normal(jax.random.PRNGKey(0), (N, C, H, W), jnp.float32)
    theta = _identity_theta(N)  # exactly AffineTransform.identity_params

    out = jax.block_until_ready(affine_transform_forward(x, theta))
    assert out.shape == x.shape and out.dtype == x.dtype
    assert jnp.allclose(out, x, atol=1e-5), float(jnp.max(jnp.abs(out - x)))

    theta2 = theta + 0.1 * jax.random.normal(jax.random.PRNGKey(1),
                                             theta.shape, jnp.float32)
    out2 = jax.block_until_ready(affine_transform_forward(x, theta2))
    ref2 = _ref_forward(x, theta2)
    assert jnp.allclose(out2, ref2, atol=1e-4), float(jnp.max(jnp.abs(out2 - ref2)))

    # --- test 2: multiple output tiles (explicit tile_out) ---
    x_b = jax.random.normal(jax.random.PRNGKey(2), (2, 3, 32, 32), jnp.float32)
    theta_b = _identity_theta(2) + 0.05 * jax.random.normal(
        jax.random.PRNGKey(3), (2, 2, 3), jnp.float32)
    out_b = jax.block_until_ready(
        affine_transform_forward(x_b, theta_b, tile_out=256))
    ref_b = _ref_forward(x_b, theta_b)
    assert jnp.allclose(out_b, ref_b, atol=1e-4), \
        float(jnp.max(jnp.abs(out_b - ref_b)))

    # --- test 3: non-power-of-two W, HW not a multiple of 128 (padded tile) ---
    x_c = jax.random.normal(jax.random.PRNGKey(4), (1, 2, 16, 20), jnp.float32)
    theta_c = _identity_theta(1) + 0.05 * jax.random.normal(
        jax.random.PRNGKey(5), (1, 2, 3), jnp.float32)
    out_c = jax.block_until_ready(affine_transform_forward(x_c, theta_c))
    ref_c = _ref_forward(x_c, theta_c)
    assert jnp.allclose(out_c, ref_c, atol=1e-4), \
        float(jnp.max(jnp.abs(out_c - ref_c)))

    # --- test 4: H > W (gather along H path) + padded output tile ---
    x_d = jax.random.normal(jax.random.PRNGKey(6), (1, 2, 24, 8), jnp.float32)
    theta_d = _identity_theta(1) + 0.05 * jax.random.normal(
        jax.random.PRNGKey(7), (1, 2, 3), jnp.float32)
    out_d = jax.block_until_ready(affine_transform_forward(x_d, theta_d))
    ref_d = _ref_forward(x_d, theta_d)
    assert jnp.allclose(out_d, ref_d, atol=1e-4), \
        float(jnp.max(jnp.abs(out_d - ref_d)))

    print("KERNEL_OK")
</pallas_src>

<mosaic_0001>
module attributes {stable_mosaic.version = 11 : i64} {
  func.func @_affine_grid_sample_kernel(%arg0: i32, %arg1: i32, %arg2: memref<2x6xf32, #tpu.memory_space<smem>>, %arg3: memref<1x4x16x16xf32, #tpu.memory_space<vmem>>, %arg4: memref<1x4x256xf32, #tpu.memory_space<vmem>>) attributes {dimension_semantics = [#tpu.dimension_semantics<parallel>, #tpu.dimension_semantics<arbitrary>], iteration_bounds = array<i64: 2, 1>, scalar_prefetch = 1 : i64, scratch_operands = 0 : i64, tpu.core_type = #tpu.core_type<tc>, window_params = [{transform_indices = @transform_0, window_bounds = array<i64: 1, 4, 16, 16>}, {transform_indices = @transform_1, window_bounds = array<i64: 1, 4, 256>}]} {
    %0 = arith.index_cast %arg0 : i32 to index
    %c0 = arith.constant 0 : index
    %1 = memref.load %arg2[%0, %c0] : memref<2x6xf32, #tpu.memory_space<smem>>
    %2 = arith.index_cast %arg0 : i32 to index
    %c1 = arith.constant 1 : index
    %3 = memref.load %arg2[%2, %c1] : memref<2x6xf32, #tpu.memory_space<smem>>
    %4 = arith.index_cast %arg0 : i32 to index
    %c2 = arith.constant 2 : index
    %5 = memref.load %arg2[%4, %c2] : memref<2x6xf32, #tpu.memory_space<smem>>
    %6 = arith.index_cast %arg0 : i32 to index
    %c3 = arith.constant 3 : index
    %7 = memref.load %arg2[%6, %c3] : memref<2x6xf32, #tpu.memory_space<smem>>
    %8 = arith.index_cast %arg0 : i32 to index
    %c4 = arith.constant 4 : index
    %9 = memref.load %arg2[%8, %c4] : memref<2x6xf32, #tpu.memory_space<smem>>
    %10 = arith.index_cast %arg0 : i32 to index
    %c5 = arith.constant 5 : index
    %11 = memref.load %arg2[%10, %c5] : memref<2x6xf32, #tpu.memory_space<smem>>
    %12 = tpu.iota {dimensions = array<i32: 1>} : vector<1x256xi32>
    %c256_i32 = arith.constant 256 : i32
    %13 = arith.muli %arg1, %c256_i32 : i32
    %14 = vector.broadcast %13 : i32 to vector<1x256xi32>
    %15 = arith.addi %12, %14 : vector<1x256xi32>
    %c4_i32 = arith.constant 4 : i32
    %16 = vector.broadcast %c4_i32 : i32 to vector<1x256xi32>
    %17 = arith.shrsi %15, %16 : vector<1x256xi32>
    %18 = arith.sitofp %17 : vector<1x256xi32> to vector<1x256xf32>
    %c15_i32 = arith.constant 15 : i32
    %19 = vector.broadcast %c15_i32 : i32 to vector<1x256xi32>
    %20 = arith.andi %15, %19 : vector<1x256xi32>
    %21 = arith.sitofp %20 : vector<1x256xi32> to vector<1x256xf32>
    %cst = arith.constant 2.000000e+00 : f32
    %22 = vector.broadcast %cst : f32 to vector<1x256xf32>
    %23 = arith.mulf %22, %21 : vector<1x256xf32>
    %cst_0 = arith.constant 1.000000e+00 : f32
    %24 = vector.broadcast %cst_0 : f32 to vector<1x256xf32>
    %25 = arith.addf %23, %24 : vector<1x256xf32>
    %cst_1 = arith.constant 1.600000e+01 : f32
    %26 = vector.broadcast %cst_1 : f32 to vector<1x256xf32>
    %27 = arith.divf %25, %26 : vector<1x256xf32>
    %cst_2 = arith.constant 1.000000e+00 : f32
    %28 = vector.broadcast %cst_2 : f32 to vector<1x256xf32>
    %29 = arith.subf %27, %28 : vector<1x256xf32>
    %cst_3 = arith.constant 2.000000e+00 : f32
    %30 = vector.broadcast %cst_3 : f32 to vector<1x256xf32>
    %31 = arith.mulf %30, %18 : vector<1x256xf32>
    %cst_4 = arith.constant 1.000000e+00 : f32
    %32 = vector.broadcast %cst_4 : f32 to vector<1x256xf32>
    %33 = arith.addf %31, %32 : vector<1x256xf32>
    %cst_5 = arith.constant 1.600000e+01 : f32
    %34 = vector.broadcast %cst_5 : f32 to vector<1x256xf32>
    %35 = arith.divf %33, %34 : vector<1x256xf32>
    %cst_6 = arith.constant 1.000000e+00 : f32
    %36 = vector.broadcast %cst_6 : f32 to vector<1x256xf32>
    %37 = arith.subf %35, %36 : vector<1x256xf32>
    %38 = vector.broadcast %1 : f32 to vector<1x256xf32>
    %39 = arith.mulf %38, %29 : vector<1x256xf32>
    %40 = vector.broadcast %3 : f32 to vector<1x256xf32>
    %41 = arith.mulf %40, %37 : vector<1x256xf32>
    %42 = arith.addf %39, %41 : vector<1x256xf32>
    %43 = vector.broadcast %5 : f32 to vector<1x256xf32>
    %44 = arith.addf %42, %43 : vector<1x256xf32>
    %45 = vector.broadcast %7 : f32 to vector<1x256xf32>
    %46 = arith.mulf %45, %29 : vector<1x256xf32>
    %47 = vector.broadcast %9 : f32 to vector<1x256xf32>
    %48 = arith.mulf %47, %37 : vector<1x256xf32>
    %49 = arith.addf %46, %48 : vector<1x256xf32>
    %50 = vector.broadcast %11 : f32 to vector<1x256xf32>
    %51 = arith.addf %49, %50 : vector<1x256xf32>
    %cst_7 = arith.constant 1.000000e+00 : f32
    %52 = vector.broadcast %cst_7 : f32 to vector<1x256xf32>
    %53 = arith.addf %44, %52 : vector<1x256xf32>
    %cst_8 = arith.constant 1.600000e+01 : f32
    %54 = vector.broadcast %cst_8 : f32 to vector<1x256xf32>
    %55 = arith.mulf %53, %54 : vector<1x256xf32>
    %cst_9 = arith.constant 1.000000e+00 : f32
    %56 = vector.broadcast %cst_9 : f32 to vector<1x256xf32>
    %57 = arith.subf %55, %56 : vector<1x256xf32>
    %cst_10 = arith.constant 5.000000e-01 : f32
    %58 = vector.broadcast %cst_10 : f32 to vector<1x256xf32>
    %59 = arith.mulf %57, %58 : vector<1x256xf32>
    %cst_11 = arith.constant 1.000000e+00 : f32
    %60 = vector.broadcast %cst_11 : f32 to vector<1x256xf32>
    %61 = arith.addf %51, %60 : vector<1x256xf32>
    %cst_12 = arith.constant 1.600000e+01 : f32
    %62 = vector.broadcast %cst_12 : f32 to vector<1x256xf32>
    %63 = arith.mulf %61, %62 : vector<1x256xf32>
    %cst_13 = arith.constant 1.000000e+00 : f32
    %64 = vector.broadcast %cst_13 : f32 to vector<1x256xf32>
    %65 = arith.subf %63, %64 : vector<1x256xf32>
    %cst_14 = arith.constant 5.000000e-01 : f32
    %66 = vector.broadcast %cst_14 : f32 to vector<1x256xf32>
    %67 = arith.mulf %65, %66 : vector<1x256xf32>
    %68 = math.floor %59 : vector<1x256xf32>
    %69 = math.floor %67 : vector<1x256xf32>
    %70 = arith.subf %59, %68 : vector<1x256xf32>
    %cst_15 = arith.constant 1.000000e+00 : f32
    %71 = vector.broadcast %cst_15 : f32 to vector<1x256xf32>
    %72 = arith.subf %71, %70 : vector<1x256xf32>
    %73 = arith.subf %67, %69 : vector<1x256xf32>
    %cst_16 = arith.constant 1.000000e+00 : f32
    %74 = vector.broadcast %cst_16 : f32 to vector<1x256xf32>
    %75 = arith.subf %74, %73 : vector<1x256xf32>
    %76 = arith.fptosi %68 : vector<1x256xf32> to vector<1x256xi32>
    %c1_i32 = arith.constant 1 : i32
    %77 = vector.broadcast %c1_i32 : i32 to vector<1x256xi32>
    %78 = arith.addi %76, %77 : vector<1x256xi32>
    %79 = arith.fptosi %69 : vector<1x256xf32> to vector<1x256xi32>
    %c1_i32_17 = arith.constant 1 : i32
    %80 = vector.broadcast %c1_i32_17 : i32 to vector<1x256xi32>
    %81 = arith.addi %79, %80 : vector<1x256xi32>
    %c0_i32 = arith.constant 0 : i32
    %82 = vector.broadcast %c0_i32 : i32 to vector<1x256xi32>
    %83 = arith.cmpi sge, %76, %82 : vector<1x256xi32>
    %c16_i32 = arith.constant 16 : i32
    %84 = vector.broadcast %c16_i32 : i32 to vector<1x256xi32>
    %85 = arith.cmpi slt, %76, %84 : vector<1x256xi32>
    %86 = arith.andi %83, %85 : vector<1x256xi1>
    %cst_18 = arith.constant 0.000000e+00 : f32
    %87 = vector.broadcast %cst_18 : f32 to vector<1x256xf32>
    %88 = arith.select %86, %72, %87 : vector<1x256xi1>, vector<1x256xf32>
    %c0_i32_19 = arith.constant 0 : i32
    %89 = vector.broadcast %c0_i32_19 : i32 to vector<1x256xi32>
    %90 = arith.cmpi sge, %78, %89 : vector<1x256xi32>
    %c16_i32_20 = arith.constant 16 : i32
    %91 = vector.broadcast %c16_i32_20 : i32 to vector<1x256xi32>
    %92 = arith.cmpi slt, %78, %91 : vector<1x256xi32>
    %93 = arith.andi %90, %92 : vector<1x256xi1>
    %cst_21 = arith.constant 0.000000e+00 : f32
    %94 = vector.broadcast %cst_21 : f32 to vector<1x256xf32>
    %95 = arith.select %93, %70, %94 : vector<1x256xi1>, vector<1x256xf32>
    %c0_i32_22 = arith.constant 0 : i32
    %96 = vector.broadcast %c0_i32_22 : i32 to vector<1x256xi32>
    %97 = arith.cmpi sge, %79, %96 : vector<1x256xi32>
    %c16_i32_23 = arith.constant 16 : i32
    %98 = vector.broadcast %c16_i32_23 : i32 to vector<1x256xi32>
    %99 = arith.cmpi slt, %79, %98 : vector<1x256xi32>
    %100 = arith.andi %97, %99 : vector<1x256xi1>
    %cst_24 = arith.constant 0.000000e+00 : f32
    %101 = vector.broadcast %cst_24 : f32 to vector<1x256xf32>
    %102 = arith.select %100, %75, %101 : vector<1x256xi1>, vector<1x256xf32>
    %c0_i32_25 = arith.constant 0 : i32
    %103 = vector.broadcast %c0_i32_25 : i32 to vector<1x256xi32>
    %104 = arith.cmpi sge, %81, %103 : vector<1x256xi32>
    %c16_i32_26 = arith.constant 16 : i32
    %105 = vector.broadcast %c16_i32_26 : i32 to vector<1x256xi32>
    %106 = arith.cmpi slt, %81, %105 : vector<1x256xi32>
    %107 = arith.andi %104, %106 : vector<1x256xi1>
    %cst_27 = arith.constant 0.000000e+00 : f32
    %108 = vector.broadcast %cst_27 : f32 to vector<1x256xf32>
    %109 = arith.select %107, %73, %108 : vector<1x256xi1>, vector<1x256xf32>
    %c0_i32_28 = arith.constant 0 : i32
    %c15_i32_29 = arith.constant 15 : i32
    %110 = vector.broadcast %c0_i32_28 : i32 to vector<1x256xi32>
    %111 = arith.maxsi %110, %76 : vector<1x256xi32>
    %112 = vector.broadcast %c15_i32_29 : i32 to vector<1x256xi32>
    %113 = arith.minsi %112, %111 : vector<1x256xi32>
    %c0_i32_30 = arith.constant 0 : i32
    %c15_i32_31 = arith.constant 15 : i32
    %114 = vector.broadcast %c0_i32_30 : i32 to vector<1x256xi32>
    %115 = arith.maxsi %114, %78 : vector<1x256xi32>
    %116 = vector.broadcast %c15_i32_31 : i32 to vector<1x256xi32>
    %117 = arith.minsi %116, %115 : vector<1x256xi32>
    %c0_i32_32 = arith.constant 0 : i32
    %c15_i32_33 = arith.constant 15 : i32
    %118 = vector.broadcast %c0_i32_32 : i32 to vector<1x256xi32>
    %119 = arith.maxsi %118, %79 : vector<1x256xi32>
    %120 = vector.broadcast %c15_i32_33 : i32 to vector<1x256xi32>
    %121 = arith.minsi %120, %119 : vector<1x256xi32>
    %c0_i32_34 = arith.constant 0 : i32
    %c15_i32_35 = arith.constant 15 : i32
    %122 = vector.broadcast %c0_i32_34 : i32 to vector<1x256xi32>
    %123 = arith.maxsi %122, %81 : vector<1x256xi32>
    %124 = vector.broadcast %c15_i32_35 : i32 to vector<1x256xi32>
    %125 = arith.minsi %124, %123 : vector<1x256xi32>
    %126 = tpu.iota {dimensions = array<i32: 0>} : vector<16x256xi32>
    %127 = tpu.iota {dimensions = array<i32: 0>} : vector<16x256xi32>
    %128 = vector.broadcast %113 : vector<1x256xi32> to vector<16x256xi32>
    %129 = arith.cmpi eq, %126, %128 : vector<16x256xi32>
    %cst_36 = arith.constant 0.000000e+00 : f32
    %130 = vector.shape_cast %88 : vector<1x256xf32> to vector<1x256xf32>
    %131 = vector.broadcast %130 : vector<1x256xf32> to vector<16x256xf32>
    %132 = vector.broadcast %cst_36 : f32 to vector<16x256xf32>
    %133 = arith.select %129, %131, %132 : vector<16x256xi1>, vector<16x256xf32>
    %134 = vector.broadcast %117 : vector<1x256xi32> to vector<16x256xi32>
    %135 = arith.cmpi eq, %126, %134 : vector<16x256xi32>
    %cst_37 = arith.constant 0.000000e+00 : f32
    %136 = vector.shape_cast %95 : vector<1x256xf32> to vector<1x256xf32>
    %137 = vector.broadcast %136 : vector<1x256xf32> to vector<16x256xf32>
    %138 = vector.broadcast %cst_37 : f32 to vector<16x256xf32>
    %139 = arith.select %135, %137, %138 : vector<16x256xi1>, vector<16x256xf32>
    %140 = arith.addf %133, %139 : vector<16x256xf32>
    %141 = vector.broadcast %121 : vector<1x256xi32> to vector<16x256xi32>
    %142 = arith.cmpi eq, %127, %141 : vector<16x256xi32>
    %cst_38 = arith.constant 0.000000e+00 : f32
    %143 = vector.shape_cast %102 : vector<1x256xf32> to vector<1x256xf32>
    %144 = vector.broadcast %143 : vector<1x256xf32> to vector<16x256xf32>
    %145 = vector.broadcast %cst_38 : f32 to vector<16x256xf32>
    %146 = arith.select %142, %144, %145 : vector<16x256xi1>, vector<16x256xf32>
    %147 = vector.broadcast %125 : vector<1x256xi32> to vector<16x256xi32>
    %148 = arith.cmpi eq, %127, %147 : vector<16x256xi32>
    %cst_39 = arith.constant 0.000000e+00 : f32
    %149 = vector.shape_cast %109 : vector<1x256xf32> to vector<1x256xf32>
    %150 = vector.broadcast %149 : vector<1x256xf32> to vector<16x256xf32>
    %151 = vector.broadcast %cst_39 : f32 to vector<16x256xf32>
    %152 = arith.select %148, %150, %151 : vector<16x256xi1>, vector<16x256xf32>
    %153 = arith.addf %146, %152 : vector<16x256xf32>
    %c0_40 = arith.constant 0 : index
    %c0_41 = arith.constant 0 : index
    %c0_42 = arith.constant 0 : index
    %c0_43 = arith.constant 0 : index
    %154 = vector.load %arg3[%c0_40, %c0_41, %c0_42, %c0_43] : memref<1x4x16x16xf32, #tpu.memory_space<vmem>>, vector<1x4x16x16xf32>
    %155 = vector.shape_cast %154 : vector<1x4x16x16xf32> to vector<4x16x16xf32>
    %156 = vector.shape_cast %155 : vector<4x16x16xf32> to vector<64x16xf32>
    %cst_44 = arith.constant dense<0.000000e+00> : vector<64x256xf32>
    %157 = tpu.matmul %156, %140, %cst_44 {dimension_numbers = #tpu.dot_dimension_numbers<[1], [0], [0], [1], [0, 0, 1, 1], [], []>} : vector<64x16xf32>, vector<16x256xf32>, vector<64x256xf32> -> vector<64x256xf32>
    %158 = vector.shape_cast %157 : vector<64x256xf32> to vector<4x16x256xf32>
    %159 = vector.shape_cast %153 : vector<16x256xf32> to vector<1x16x256xf32>
    %160 = vector.broadcast %159 : vector<1x16x256xf32> to vector<4x16x256xf32>
    %161 = arith.mulf %158, %160 : vector<4x16x256xf32>
    %cst_45 = arith.constant dense<0.000000e+00> : vector<4x256xf32>
    %162 = vector.multi_reduction <add>, %161, %cst_45 [1] : vector<4x16x256xf32> to vector<4x256xf32>
    %c0_46 = arith.constant 0 : index
    %c0_47 = arith.constant 0 : index
    %c0_48 = arith.constant 0 : index
    %163 = vector.load %arg4[%c0_46, %c0_47, %c0_48] : memref<1x4x256xf32, #tpu.memory_space<vmem>>, vector<1x4x256xf32>
    %164 = vector.shape_cast %163 : vector<1x4x256xf32> to vector<4x256xf32>
    %165 = vector.shape_cast %162 : vector<4x256xf32> to vector<1x4x256xf32>
    tpu.vector_store %arg4[%c0_46, %c0_47, %c0_48], %165 {strides = array<i32>} : memref<1x4x256xf32, #tpu.memory_space<vmem>>, vector<1x4x256xf32>,
    return
  }
  func.func @transform_0(%arg0: i32, %arg1: i32, %arg2: memref<2x6xf32, #tpu.memory_space<smem>>) -> (i32, i32, i32, i32) {
    %c0_i32 = arith.constant 0 : i32
    %c0_i32_0 = arith.constant 0 : i32
    %c0_i32_1 = arith.constant 0 : i32
    %c0_i32_2 = arith.constant 0 : i32
    return %arg0, %c0_i32, %c0_i32_0, %c0_i32_1 : i32, i32, i32, i32
  }
  func.func @transform_1(%arg0: i32, %arg1: i32, %arg2: memref<2x6xf32, #tpu.memory_space<smem>>) -> (i32, i32, i32) {
    %c0_i32 = arith.constant 0 : i32
    %c0_i32_0 = arith.constant 0 : i32
    return %arg0, %c0_i32, %arg1 : i32, i32, i32
  }
}

</mosaic_0001>

<bundles_post_ra>
// kernel: tpu_custom_call.1
= control target key start
LH: loop header
LB: loop body
LE: loop exit
PB: predicated region body
PF: predicated region fallthrough
CT: control target
= control target key end

     0   :  { %s1246_s0 = inlined_call_operand.hbm [shape: f32[2,6], index: 0, kind: input, shape index: {}]   ;;  %s1247_s1 = inlined_call_operand.hbm [shape: f32[2,4,16,16], index: 1, kind: input, shape index: {}]   ;;  %s1248_s2 = inlined_call_operand.hbm [shape: f32[2,4,256], index: 2, kind: output, shape index: {}]  }
   0x1   :  { %s823_s11 = scalar_lea.hbm %s1246_s0, 32 }
   0x2   :  { %p824_p0 = scmp.ne.s32.totalorder %s1246_s0, %s823_s11  ;;  %p827_p1 = scmp.lt.u32.totalorder %s823_s11, %s1246_s0 }
   0x4   :  { %p829_p2 = pnand %p827_p1, %p824_p0 }
   0x6   :  { %832 = shalt.err (!%p829_p2)  }
   0x7   :  { %s949_s16 = smov [#allocation3]  }
   0x8   :  { %8 = dma.hbm_to_smem %s1246_s0, 32, %s949_s16, [#allocation2] }
   0x9   :  { %915 = dma.done.wait [#allocation2], 32 }
   0xa   :  { %916 = vsyncadd [#allocation2], 4294967264 }
   0xb   :  { %10 = sfence }
   0xc   :  { %11 = vsyncpa [#allocation5], 0 }
   0xd   :  { %13 = vsyncpa [#allocation5 + $0x1], 0 }
   0xe   :  { %14 = vsyncpa [#allocation6], 0 }
   0xf   :  { %16 = vsyncpa [#allocation6 + $0x1], 0  ;;  %s982_s19 = smov 0   ;;  %s984_s20 = smov 0  }
  0x10   :  { %s986_s21 = smov 0   ;;  %s988_s22 = smov 0  }
  0x11   :  { %s990_s23 = smov 0   ;;  %s992_s24 = smov 0  }
  0x12 LB: > { %s709_s0 = sadd.s32 4294967295, %s947_s24   ;;  %s710_s25 = sadd.s32 4294967294, %s947_s24   ;;  %s947_s24 = sphi %s992_s24, %s22_s24   ;;  %s943_s23 = sphi %s990_s23, %s1263_s23   ;;  %s939_s22 = sphi %s988_s22, %s1262_s22   ;;  %s935_s21 = sphi %s986_s21, %s1261_s21   ;;  %s931_s20 = sphi %s984_s20, %s1260_s20   ;;  %s927_s19 = sphi %s982_s19, %s1259_s19  }
  0x13   : > { %s34_s26 = sadd.s32 1, %s943_s23  ;;  %s41_s27 = sadd.s32 1, %s935_s21 }
  0x14   : > { %p36_p3 = scmp.ge.s32.totalorder %s34_s26, 2  ;;  %p48_p4 = scmp.ne.s32.totalorder %s935_s21, %s931_s20 }
  0x15   : > { %p49_p5 = scmp.eq.s32.totalorder %s947_s24, 0  ;;  %p54_p6 = scmp.ne.s32.totalorder %s931_s20, %s927_s19 }
  0x16   : > { %s1265_s26 = smov (%p36_p3, %s34_s26), 0  ;;  %p55_p8 = scmp.eq.s32.totalorder %s709_s0, 0 }
  0x17   : > { %p1023_p7 = por %p49_p5, %p48_p4  ;;  %s38_s29 = ssub.s32 %s943_s23, %s1265_s26 }
  0x18   : > { %p80_p9 = scmp.eq.s32.totalorder %s709_s0, 1  ;;  %p39_p10 = scmp.eq.s32.totalorder %s38_s29, 0 }
  0x19   : > { %p1029_p11 = por %p55_p8, %p54_p6  ;;  %p86_p13 = scmp.eq.s32.totalorder %s710_s25, 1 }
  0x1a   : > { %p1033_p12 = por %p80_p9, %p48_p4  ;;  %p769_p2 = scmp.lt.s32.totalorder %s947_s24, 2 }
  0x1b   : > { %s1038_s4 = scalar_select %p39_p10, %s935_s21, %s41_s27  }
  0x1c   : > { %s1252_s3 = scalar_select %p1033_p12, 1, 0 }
  0x1d   : > { %p1040_p0 = por %p86_p13, %p54_p6  ;;  %s106_s6 = sand.u32 1, %s935_s21  }
  0x1e   : > { %s713_s7 = sshll.u32 %s106_s6, 6  ;;  %s741_s8 = sshll.u32 %s943_s23, 10 }
  0x1f   : > { %s1253_s5 = scalar_select %p1040_p0, 1, 0 }
  0x20   : > { %s1051_s11 = scalar_lea.hbm %s1247_s1, %s741_s8  ;;  %s110_s12 = scalar_lea.vmem [#allocation4], %s713_s7 }
  0x21   : > { %s117_s13 = sshll.u32 %s110_s12, 4  ;;  %p1057_p3 = pnand %p769_p2, %p1023_p7  ;;  %s1053_s13 = int_to_ptr.vmem [resolvable:$true] %s117_s13 }
  0x22   : > { %s1062_s15 = scalar_lea.sflag [#allocation5], %s106_s6  ;;  %s833_s16 = scalar_lea.hbm %s1051_s11, 1024 }
  0x23   : > { %p834_p5 = scmp.ne.s32.totalorder %s1051_s11, %s833_s16  ;;  %p835_p6 = pneg %p1057_p3 }
  0x24   : > { %s838_s0 = scalar_lea.hbm %s1247_s1, 2048  ;;  %p839_p7 = scmp.lt.u32.totalorder %s1051_s11, %s1247_s1 }
  0x25   : > { %p836_p8 = pnand %p835_p6, %p834_p5  ;;  %p840_p10 = scmp.lt.u32.totalorder %s838_s0, %s833_s16 }
  0x26   : > { %p842_p2 = scmp.lt.u32.totalorder %s833_s16, %s1051_s11 }
  0x27   : > { %p837_p9 = pneg %p836_p8  ;;  %p841_p13 = por %p840_p10, %p839_p7 }
  0x29   : > { %p843_p1 = por %p842_p2, %p841_p13 }
  0x2b   : > { %p844_p4 = pnand %p843_p1, %p837_p9 }
  0x2d   : > { %847 = shalt.err (!%p844_p4)
}
  0x2e   : > { %s848_s28 = scalar_lea.vmem %s1053_s13, 1024  ;;  %s950_s29 = smov [#allocation4]  }
  0x2f   : > { %p849_p5 = scmp.ne.s32.totalorder %s1053_s13, %s848_s28  ;;  %s853_s6 = sshll.u32 %s950_s29, 4  ;;  %s854_s6 = int_to_ptr.vmem [resolvable:$false] %s853_s6 }
  0x30   : > { %s855_s7 = scalar_lea.vmem %s854_s6, 2048  ;;  %p856_p12 = scmp.lt.s32.totalorder %s1053_s13, %s854_s6 }
  0x31   : > { %p851_p8 = pnand %p849_p5, %p835_p6  ;;  %p857_p7 = scmp.lt.s32.totalorder %s855_s7, %s848_s28 }
  0x33   : > { %p852_p0 = pneg %p851_p8  ;;  %p858_p10 = por %p857_p7, %p856_p12 }
  0x35   : > { %p859_p13 = pnand %p858_p10, %p852_p0 }
  0x37   : > { %862 = shalt.err (!%p859_p13)
}
  0x38   : > { %s951_s8 = smov 128   ;;  %s952_s9 = smov 8  }
  0x39   : > { %764 = dma.hbm_to_vmem [thread:$0]  (!%p1057_p3), %s1051_s11, 1024, %s1053_s13, %s1062_s15, %s951_s8, %s951_s8, %s952_s9  }
  0x3a   : > { %p125_p1 = scmp.lt.s32.totalorder %s947_s24, 3  ;;  %p1255_p4 = scmp.ge.s32.totalorder %s947_s24, 1 }
  0x3c   : > { %p126_p6 = pnand %p1255_p4, %p125_p1 }
  0x3d   : > { %s1094_s10 = sand.u32 (!%p126_p6), 1, %s931_s20  }
  0x3e   : > { %129 = sbr.rel (%p126_p6) target bundleno = 392 (0x188), region = 24  ;;  %s717_s12 = sshll.u32 (!%p126_p6), %s1094_s10, 6 }
  0x3f   : > { %s132_s16 = scalar_lea.sflag (!%p126_p6), [#allocation5], %s1094_s10  ;;  %s1098_s17 = scalar_lea.vmem (!%p126_p6), [#allocation4], %s717_s12 }
  0x45   : > { %918 = dma.done.wait (%p1029_p11), %s132_s16, 1024  }
  0x46   : > { %920 = vsyncadd (%p1029_p11), %s132_s16, 4294966272  ;;  %s1105_s11 = sshll.u32 %s939_s22, 7  ;;  %v167_v0 = vlaneseq  ;;  %v953_v1 = vmov 0.0   ;;  %s718_s6 = sshll.u32 %s1094_s10, 3 }
  0x47   : > { %461 = vmatprep.mubr.f32.mxu0 %v953_v1  ;;  %485 = vmatprep.mubr.f32.mxu1 %v953_v1  ;;  %s157_s13 = sadd.s32 1, %s1105_s11  ;;  %s161_s14 = sadd.s32 3, %s1105_s11 }
  0x48   : > { %v168_v2 = vand.u32 127, %v167_v0  ;;  %s1113_s30 = sld [smem:[#allocation3 + %s1105_s11]]  ;;  %s163_s15 = sadd.s32 4, %s1105_s11  ;;  %v1140_v54 = vshrl.u32 %v167_v0, 7 }
  0x49   : > { %s1116_s22 = sld [smem:[#allocation3 + %s157_s13]]  ;;  %s159_s25 = sadd.s32 2, %s1105_s11 }
  0x4a   : > { %v169_v3 = vadd.s32 128, %v168_v2  ;;  %v174_v4 = vshra.s32 %v168_v2, 4  ;;  %v178_v5 = vand.u32 15, %v168_v2  ;;  %s1118_s18 = sld [smem:[#allocation3 + %s161_s14]]  ;;  %v1143_v62 = vadd.s32 8, %v1140_v54  ;;  %s165_s28 = sadd.s32 5, %s1105_s11 }
  0x4b   : > { %s1120_s0 = sld [smem:[#allocation3 + %s163_s15]]  ;;  %s153_s7 = scalar_lea.vmem [#allocation7], %s718_s6 }
  0x4c   : > { %v175_v6 = vshra.s32 %v169_v3, 4  ;;  %v179_v7 = vand.u32 15, %v169_v3  ;;  %v176_v8 = vcvt.s32.f32 %v174_v4  ;;  %v180_v9 = vcvt.s32.f32 %v178_v5  ;;  %s160_s27 = sld [smem:[#allocation3 + %s159_s25]]  ;;  %s628_s8 = sshll.u32 %s153_s7, 4  ;;  %s1199_s8 = int_to_ptr.vmem [resolvable:$true] %s628_s8 }
  0x4d   : > { %s166_s29 = sld [smem:[#allocation3 + %s165_s28]]  ;;  %s1197_s16 = scalar_lea.hbm %s1248_s2, %s1105_s11 }
  0x4e   : > { %v177_v10 = vcvt.s32.f32 %v175_v6  ;;  %v181_v11 = vcvt.s32.f32 %v179_v7  ;;  %v182_v12 = vmul.f32 2.0, %v180_v9  ;;  %v191_v13 = vmul.f32 2.0, %v176_v8  ;;  %s863_s13 = scalar_lea.vmem %s1199_s8, 128  ;;  %p1256_p12 = scmp.ne.s32.totalorder %s1252_s3, 0 }
  0x4f   : > { %v199_v21 = vstv %s1113_s30  ;;  %v202_v22 = vstv %s1116_s22  ;;  %p864_p11 = scmp.ne.s32.totalorder %s1199_s8, %s863_s13  ;;  %s954_s14 = smov [#allocation7]  }
  0x50   : > { %v183_v14 = vmul.f32 2.0, %v181_v11  ;;  %v192_v15 = vmul.f32 2.0, %v177_v10  ;;  %v184_v16 = vadd.f32 1.0, %v182_v12  ;;  %v193_v17 = vadd.f32 1.0, %v191_v13  ;;  %s867_s30 = sshll.u32 %s954_s14, 4  ;;  %s868_s30 = int_to_ptr.vmem [resolvable:$false] %s867_s30 }
  0x51   : > { %v210_v23 = vstv %s1118_s18  ;;  %v213_v27 = vstv %s1120_s0  ;;  %p865_p0 = pnand %p864_p11, %p1256_p12  ;;  %s869_s15 = scalar_lea.vmem %s868_s30, 256 }
  0x52   : > { %v185_v18 = vadd.f32 1.0, %v183_v14  ;;  %v194_v19 = vadd.f32 1.0, %v192_v15  ;;  %v187_v20 = vmul.f32 0.0625, %v184_v16  ;;  %v195_v24 = vmul.f32 0.0625, %v193_v17  ;;  %p870_p9 = scmp.lt.s32.totalorder %s1199_s8, %s868_s30  ;;  %p871_p2 = scmp.lt.s32.totalorder %s869_s15, %s863_s13 }
  0x53   : > { %v207_v38 = vstv %s160_s27  ;;  %p866_p3 = pneg %p865_p0 }
  0x54   : > { %v188_v25 = vmul.f32 0.0625, %v185_v18  ;;  %v196_v26 = vmul.f32 0.0625, %v194_v19  ;;  %v720_v28 = vadd.f32 -1.0, %v187_v20  ;;  %v722_v29 = vadd.f32 -1.0, %v195_v24  ;;  %p872_p5 = por %p871_p2, %p870_p9 }
  0x56   : > { %v1127_v30 = vadd.f32 -1.0, %v188_v25  ;;  %v1129_v31 = vadd.f32 -1.0, %v196_v26  ;;  %v200_v32 = vmul.f32 %v720_v28, %v199_v21  ;;  %v211_v33 = vmul.f32 %v720_v28, %v210_v23  ;;  %p873_p8 = pnand %p872_p5, %p866_p3 }
  0x57   : > { %v203_v34 = vmul.f32 %v722_v29, %v202_v22  ;;  %v214_v35 = vmul.f32 %v722_v29, %v213_v27 }
  0x58   : > { %v201_v36 = vmul.f32 %v1127_v30, %v199_v21  ;;  %v204_v37 = vmul.f32 %v1129_v31, %v202_v22 }
  0x59   : > { %v205_v39 = vadd.f32 %v203_v34, %v200_v32  ;;  %v1137_v40 = vadd.f32 %v214_v35, %v211_v33  ;;  %v364_v33 = vld [vmem:[%s1098_s17] sm:$0xff]  ;;  %v365_v35 = vld [vmem:[%s1098_s17 + $0x8] sm:$0xff] }
  0x5a   : > { %v206_v41 = vadd.f32 %v204_v37, %v201_v36  ;;  %v368_v34 = vld [vmem:[%s1098_s17 + $0x20] sm:$0xff]  ;;  %v369_v36 = vld [vmem:[%s1098_s17 + $0x28] sm:$0xff]  ;;  %v366_v37 = vld [vmem:[%s1098_s17 + $0x10] sm:$0xff] }
  0x5b   : > { %v208_v42 = vadd.f32 %v207_v38, %v205_v39  ;;  %v367_v39 = vld [vmem:[%s1098_s17 + $0x18] sm:$0xff] }
  0x5c   : > { %v209_v43 = vadd.f32 %v207_v38, %v206_v41  ;;  %v370_v38 = vld [vmem:[%s1098_s17 + $0x30] sm:$0xff]  ;;  %v371_v41 = vld [vmem:[%s1098_s17 + $0x38] sm:$0xff]  ;;  %s612_s17 = scalar_lea.sflag [#allocation6], %s1094_s10 }
  0x5d   : > { %v221_v44 = vadd.f32 1.0, %v208_v42  ;;  %v212_v42 = vmul.f32 %v1127_v30, %v210_v23 }
  0x5e   : > { %v222_v45 = vadd.f32 1.0, %v209_v43  ;;  %v215_v43 = vmul.f32 %v1129_v31, %v213_v27 }
  0x5f   : > { %v223_v46 = vmul.f32 16.0, %v221_v44 }
  0x60   : > { %v224_v47 = vmul.f32 16.0, %v222_v45  ;;  %v217_v44 = vadd.f32 %v215_v43, %v212_v42  ;;  %v218_v45 = vstv %s166_s29 }
  0x61   : > { %v724_v48 = vadd.f32 -1.0, %v223_v46  ;;  %v219_v46 = vadd.f32 %v218_v45, %v1137_v40 }
  0x62   : > { %v725_v49 = vadd.f32 -1.0, %v224_v47  ;;  %v220_v47 = vadd.f32 %v218_v45, %v217_v44 }
  0x63   : > { %v227_v50 = vmul.f32 0.5, %v724_v48 }
  0x64   : > { %v228_v51 = vmul.f32 0.5, %v725_v49  ;;  %v230_v48 = vadd.f32 1.0, %v220_v47 }
  0x65   : > { %v237_v52 = vfloor.f32 %v227_v50 }
  0x66   : > { %v238_v53 = vfloor.f32 %v228_v51 }
  0x67   : > { %v241_v55 = vsub.f32 %v227_v50, %v237_v52  ;;  %v749_v56 = vtrunc.f32 %v237_v52  ;;  %v232_v50 = vmul.f32 16.0, %v230_v48 }
  0x68   : > { %v242_v57 = vsub.f32 %v228_v51, %v238_v53  ;;  %v751_v58 = vtrunc.f32 %v238_v53 }
  0x69   : > { %v750_v59 = vcvt.f32.s32 %v749_v56  ;;  %v243_v63 = vsub.f32 1.0, %v241_v55  ;;  %v727_v52 = vadd.f32 -1.0, %v232_v50 }
  0x6a   : > { %v244_v60 = vsub.f32 1.0, %v242_v57  ;;  %v752_v61 = vcvt.f32.s32 %v751_v58 }
  0x6b   : > { %v251_v2 = vadd.s32 1, %v750_v59  ;;  %vm257_vm0 = vcmp.ge.s32.totalorder %v750_v59, 0  ;;  %vm259_vm1 = vcmp.lt.s32.totalorder %v750_v59, 16  ;;  %vm289_vm2 = vcmp.gt.s32.totalorder %v750_v59, 0 }
  0x6c   : > { %v252_v3 = vadd.s32 1, %v752_v61  ;;  %vm258_vm3 = vcmp.ge.s32.totalorder %v752_v61, 0  ;;  %vm260_vm4 = vcmp.lt.s32.totalorder %v752_v61, 16  ;;  %vm291_vm5 = vcmp.gt.s32.totalorder %v752_v61, 0  ;;  %vm261_vm6 = vmand %vm257_vm0, %vm259_vm1 }
  0x6d   : > { %vm262_vm7 = vmand %vm258_vm3, %vm260_vm4  ;;  %v292_v0 = vsel %vm291_vm5, %v752_v61, 0  ;;  %vm265_vm8 = vcmp.ge.s32.totalorder %v251_v2, 0  ;;  %vm267_vm9 = vcmp.lt.s32.totalorder %v251_v2, 16  ;;  %v263_v6 = vsel %vm261_vm6, %v243_v63, 0.0 }
  0x6e   : > { %v264_v4 = vsel %vm262_vm7, %v244_v60, 0.0  ;;  %vm266_vm10 = vcmp.ge.s32.totalorder %v252_v3, 0  ;;  %vm268_vm11 = vcmp.lt.s32.totalorder %v252_v3, 16  ;;  %vm295_vm12 = vcmp.lt.s32.totalorder %v292_v0, 15  ;;  %vm269_vm13 = vmand %vm265_vm8, %vm267_vm9 }
  0x6f   : > { %vm270_vm14 = vmand %vm266_vm10, %vm268_vm11  ;;  %v296_v5 = vsel %vm295_vm12, %v292_v0, 15  ;;  %vm299_vm15 = vcmp.gt.s32.totalorder %v252_v3, 0  ;;  %v290_v7 = vsel %vm289_vm2, %v750_v59, 0  ;;  %v271_v9 = vsel %vm269_vm13, %v241_v55, 0.0 }
  0x70   : > { %v300_v8 = vsel %vm299_vm15, %v252_v3, 0  ;;  %vm325_vm0 = vcmp.eq.s32.totalorder %v1140_v54, %v296_v5  ;;  %vm327_vm1 = vcmp.eq.s32.totalorder %v1143_v62, %v296_v5  ;;  %v272_v10 = vsel %vm270_vm14, %v242_v57, 0.0 }
  0x71   : > { %vm303_vm3 = vcmp.lt.s32.totalorder %v300_v8, 15  ;;  %v329_v11 = vsel %vm325_vm0, %v264_v4, 0.0  ;;  %vm293_vm4 = vcmp.lt.s32.totalorder %v290_v7, 15  ;;  %v331_v13 = vsel %vm327_vm1, %v264_v4, 0.0 }
  0x72   : > { %v304_v12 = vsel %vm303_vm3, %v300_v8, 15  ;;  %v294_v14 = vsel %vm293_vm4, %v290_v7, 15  ;;  %vm297_vm5 = vcmp.gt.s32.totalorder %v251_v2, 0  ;;  %vm372_vm12 = vcmask 130048  }
  0x73   : > { %vm333_vm7 = vcmp.eq.s32.totalorder %v1140_v54, %v304_v12  ;;  %vm335_vm6 = vcmp.eq.s32.totalorder %v1143_v62, %v304_v12  ;;  %v298_v15 = vsel %vm297_vm5, %v251_v2, 0  ;;  %vm324_vm2 = vcmp.eq.s32.totalorder %v1140_v54, %v294_v14 }
  0x74   : > { %v337_v16 = vsel %vm333_vm7, %v272_v10, 0.0  ;;  %v339_v17 = vsel %vm335_vm6, %v272_v10, 0.0  ;;  %vm301_vm8 = vcmp.lt.s32.totalorder %v298_v15, 15  ;;  %vm326_vm9 = vcmp.eq.s32.totalorder %v1143_v62, %v294_v14 }
  0x75   : > { %v341_v18 = vadd.f32 %v337_v16, %v329_v11  ;;  %v343_v19 = vadd.f32 %v339_v17, %v331_v13  ;;  %v302_v20 = vsel %vm301_vm8, %v298_v15, 15  ;;  %v328_v21 = vsel %vm324_vm2, %v263_v6, 0.0 }
  0x76   : > { %v330_v22 = vsel %vm326_vm9, %v263_v6, 0.0  ;;  %vm332_vm10 = vcmp.eq.s32.totalorder %v1140_v54, %v302_v20  ;;  %vm334_vm11 = vcmp.eq.s32.totalorder %v1143_v62, %v302_v20  ;;  %v236_v55 = vmul.f32 0.5, %v727_v52 }
  0x77   : > { %v743_v24 = vpack.c.bf16 %v343_v19, %v341_v18  ;;  %v336_v25 = vsel %vm332_vm10, %v271_v9, 0.0  ;;  %v338_v26 = vsel %vm334_vm11, %v271_v9, 0.0 }
  0x78   : > { %v340_v28 = vadd.f32 %v336_v25, %v328_v21  ;;  %v342_v29 = vadd.f32 %v338_v26, %v330_v22  ;;  %v240_v23 = vfloor.f32 %v236_v55 }
  0x79   : > { %744 = vmatprep.subr.bf16.mxu0 %v743_v24  ;;  %747 = vmatprep.subr.bf16.mxu1 %v743_v24 }
  0x7a   : > { %v745_v32 = vpack.c.bf16 %v342_v29, %v340_v28  ;;  %v755_v57 = vtrunc.f32 %v240_v23  ;;  %v246_v3 = vsub.f32 %v236_v55, %v240_v23 }
  0x7c   : > { %746 = vmatpush1.bf16.msra.mxu0 %v745_v32  ;;  %748 = vmatpush1.bf16.msra.mxu1 %v745_v32  ;;  %v756_v31 = vcvt.f32.s32 %v755_v57  ;;  %v248_v6 = vsub.f32 1.0, %v246_v3 }
  0x7e   : > { %v256_v59 = vadd.s32 1, %v756_v31  ;;  %vm307_vm15 = vcmp.gt.s32.totalorder %v756_v31, 0  ;;  %vm274_vm2 = vcmp.ge.s32.totalorder %v756_v31, 0  ;;  %vm276_vm8 = vcmp.lt.s32.totalorder %v756_v31, 16 }
  0x7f   : > { %728 = vmatmul.mubr.msk.f32.vlgmr.msra.gmra.mrb[0].mxu0 %vm372_vm12, %v364_v33  ;;  %732 = vmatmul.mubr.msk.f32.vlgmr.msra.gmra.mrb[0].mxu1 %vm372_vm12, %v368_v34  ;;  %v308_v63 = vsel %vm307_vm15, %v756_v31, 0  ;;  %vm278_vm15 = vmand %vm274_vm2, %vm276_vm8 }
  0x80   : > { %467 = vmatprep.mubr.f32.mxu0 %v953_v1  ;;  %491 = vmatprep.mubr.f32.mxu1 %v953_v1  ;;  %vm315_vm0 = vcmp.gt.s32.totalorder %v256_v59, 0  ;;  %vm282_vm10 = vcmp.ge.s32.totalorder %v256_v59, 0  ;;  %vm284_vm11 = vcmp.lt.s32.totalorder %v256_v59, 16  ;;  %v280_v11 = vsel %vm278_vm15, %v248_v6, 0.0 }
  0x81   : > { %v316_v2 = vsel %vm315_vm0, %v256_v59, 0  ;;  %vm286_vm0 = vmand %vm282_vm10, %vm284_vm11  ;;  %vm597_vm10 = vcmask 1045509   ;;  %vm600_vm11 = vcmask 1042434  }
  0x82   : > { %v288_v12 = vsel %vm286_vm0, %v246_v3, 0.0 }
  0x83   : > { %729 = vmatmul.mubr.msk.f32.gmra.mrb[2].mxu0 %vm372_vm12, %v365_v35  ;;  %733 = vmatmul.mubr.msk.f32.gmra.mrb[2].mxu1 %vm372_vm12, %v369_v36 }
  0x84   : > { %473 = vmatprep.mubr.f32.mxu0 %v953_v1  ;;  %497 = vmatprep.mubr.f32.mxu1 %v953_v1 }
  0x87   : > { %730 = vmatmul.mubr.msk.f32.gmra.mrb[4].mxu0 %vm372_vm12, %v366_v37  ;;  %734 = vmatmul.mubr.msk.f32.gmra.mrb[4].mxu1 %vm372_vm12, %v370_v38 }
  0x88   : > { %479 = vmatprep.mubr.f32.mxu0 %v953_v1  ;;  %503 = vmatprep.mubr.f32.mxu1 %v953_v1  ;;  %v229_v1 = vadd.f32 1.0, %v219_v46 }
  0x8a   : > { %v231_v49 = vmul.f32 16.0, %v229_v1 }
  0x8b   : > { %731 = vmatmul.mubr.msk.f32.gmra.mrb[6].mxu0 %vm372_vm12, %v367_v39  ;;  %735 = vmatmul.mubr.msk.f32.gmra.mrb[6].mxu1 %vm372_vm12, %v371_v41  ;;  %vm311_vm12 = vcmp.lt.s32.totalorder %v308_v63, 15 }
  0x8c   : > { %v726_v51 = vadd.f32 -1.0, %v231_v49  ;;  %v312_v7 = vsel %vm311_vm12, %v308_v63, 15  ;;  %vm602_vm12 = vcmask 1046534  }
  0x8d   : > { %vm347_vm2 = vcmp.eq.s32.totalorder %v1143_v62, %v312_v7 }
  0x8e   : > { %v235_v53 = vmul.f32 0.5, %v726_v51  ;;  %v351_v21 = vsel %vm347_vm2, %v280_v11, 0.0 }
  0x90   : > { %v239_v56 = vfloor.f32 %v235_v53 }
  0x92   : > { %v753_v30 = vtrunc.f32 %v239_v56  ;;  %v245_v40 = vsub.f32 %v235_v53, %v239_v56 }
  0x94   : > { %v754_v27 = vcvt.f32.s32 %v753_v30  ;;  %v247_v0 = vsub.f32 1.0, %v245_v40 }
  0x96   : > { %v255_v58 = vadd.s32 1, %v754_v27  ;;  %vm305_vm13 = vcmp.gt.s32.totalorder %v754_v27, 0  ;;  %vm273_vm1 = vcmp.ge.s32.totalorder %v754_v27, 0  ;;  %vm275_vm3 = vcmp.lt.s32.totalorder %v754_v27, 16 }
  0x97   : > { %v306_v60 = vsel %vm305_vm13, %v754_v27, 0  ;;  %vm277_vm9 = vmand %vm273_vm1, %vm275_vm3  ;;  %vm319_vm13 = vcmp.lt.s32.totalorder %v316_v2, 15 }
  0x98   : > { %vm313_vm14 = vcmp.gt.s32.totalorder %v255_v58, 0  ;;  %vm281_vm4 = vcmp.ge.s32.totalorder %v255_v58, 0  ;;  %vm283_vm5 = vcmp.lt.s32.totalorder %v255_v58, 16  ;;  %vm309_vm7 = vcmp.lt.s32.totalorder %v306_v60, 15 }
  0x99   : > { %v314_v61 = vsel %vm313_vm14, %v255_v58, 0  ;;  %vm285_vm14 = vmand %vm281_vm4, %vm283_vm5  ;;  %v310_v4 = vsel %vm309_vm7, %v306_v60, 15  ;;  %v320_v8 = vsel %vm319_vm13, %v316_v2, 15  ;;  %v279_v9 = vsel %vm277_vm9, %v247_v0, 0.0 }
  0x9a   : > { %vm317_vm6 = vcmp.lt.s32.totalorder %v314_v61, 15  ;;  %v287_v10 = vsel %vm285_vm14, %v245_v40, 0.0  ;;  %vm344_vm1 = vcmp.eq.s32.totalorder %v1140_v54, %v310_v4  ;;  %vm345_vm4 = vcmp.eq.s32.totalorder %v1140_v54, %v312_v7 }
  0x9b   : > { %v318_v5 = vsel %vm317_vm6, %v314_v61, 15  ;;  %vm353_vm5 = vcmp.eq.s32.totalorder %v1140_v54, %v320_v8  ;;  %v348_v13 = vsel %vm344_vm1, %v279_v9, 0.0  ;;  %v349_v15 = vsel %vm345_vm4, %v280_v11, 0.0 }
  0x9c   : > { %vm352_vm3 = vcmp.eq.s32.totalorder %v1140_v54, %v318_v5  ;;  %v357_v16 = vsel %vm353_vm5, %v288_v12, 0.0  ;;  %vm346_vm7 = vcmp.eq.s32.totalorder %v1143_v62, %v310_v4  ;;  %vm354_vm6 = vcmp.eq.s32.totalorder %v1143_v62, %v318_v5 }
  0x9d   : > { %v356_v14 = vsel %vm352_vm3, %v287_v10, 0.0  ;;  %vm355_vm8 = vcmp.eq.s32.totalorder %v1143_v62, %v320_v8  ;;  %v361_v18 = vadd.f32 %v357_v16, %v349_v15  ;;  %v350_v19 = vsel %vm346_vm7, %v279_v9, 0.0 }
  0x9e   : > { %v360_v17 = vadd.f32 %v356_v14, %v348_v13  ;;  %v358_v20 = vsel %vm354_vm6, %v287_v10, 0.0  ;;  %v359_v22 = vsel %vm355_vm8, %v288_v12, 0.0  ;;  %vm595_vm9 = vcmask 1041409  }
  0x9f   : > { %v362_v32 = vadd.f32 %v358_v20, %v350_v19  ;;  %v363_v35 = vadd.f32 %v359_v22, %v351_v21  ;;  %vm605_vm13 = vcmask 1043459   ;;  %vm607_vm14 = vcmask 1047559  }
 0x152   : > { %v463_v24 = vpop.f32.mrb[0].mxu0  ;;  %v487_v54 = vpop.f32.mrb[0].mxu1 }
 0x153   : > { %v510_v25 = vmul.f32 %v463_v24, %v360_v17  ;;  %v465_v26 = vpop.f32.mrb[1].mxu0  ;;  %v518_v28 = vmul.f32 %v487_v54, %v360_v17  ;;  %v489_v29 = vpop.f32.mrb[1].mxu1 }
 0x154   : > { %v511_v33 = vmul.f32 %v465_v26, %v361_v18  ;;  %v519_v34 = vmul.f32 %v489_v29, %v361_v18 }
 0x156   : > { %v469_v36 = vpop.f32.mrb[2].mxu0  ;;  %v493_v37 = vpop.f32.mrb[2].mxu1 }
 0x157   : > { %v512_v38 = vmul.f32 %v469_v36, %v362_v32  ;;  %v520_v62 = vmul.f32 %v493_v37, %v362_v32  ;;  %v471_v39 = vpop.f32.mrb[3].mxu0  ;;  %v495_v41 = vpop.f32.mrb[3].mxu1 }
 0x158   : > { %v513_v42 = vmul.f32 %v471_v39, %v363_v35  ;;  %v521_v43 = vmul.f32 %v495_v41, %v363_v35 }
 0x159   : > { %v526_v44 = vadd.f32 %v512_v38, %v510_v25  ;;  %v554_v45 = vadd.f32 %v520_v62, %v518_v28 }
 0x15a   : > { %v533_v46 = vadd.f32 %v513_v42, %v511_v33  ;;  %v561_v47 = vadd.f32 %v521_v43, %v519_v34  ;;  %v475_v1 = vpop.f32.mrb[4].mxu0  ;;  %v499_v48 = vpop.f32.mrb[4].mxu1 }
 0x15b   : > { %v527_v49 = vrot.slane %v526_v44, 4  ;;  %v555_v50 = vrot.slane %v554_v45, 4  ;;  %v514_v51 = vmul.f32 %v475_v1, %v360_v17  ;;  %v477_v52 = vpop.f32.mrb[5].mxu0  ;;  %v522_v53 = vmul.f32 %v499_v48, %v360_v17  ;;  %v501_v55 = vpop.f32.mrb[5].mxu1 }
 0x15c   : > { %v534_v56 = vrot.slane %v533_v46, 4  ;;  %v562_v23 = vrot.slane %v561_v47, 4  ;;  %v515_v30 = vmul.f32 %v477_v52, %v361_v18  ;;  %v523_v57 = vmul.f32 %v501_v55, %v361_v18 }
 0x15d   : > { %v528_v27 = vadd.f32 %v527_v49, %v526_v44  ;;  %v556_v31 = vadd.f32 %v555_v50, %v554_v45 }
 0x15e   : > { %v535_v58 = vadd.f32 %v534_v56, %v533_v46  ;;  %v563_v59 = vadd.f32 %v562_v23, %v561_v47  ;;  %v481_v40 = vpop.f32.mrb[6].mxu0  ;;  %v505_v60 = vpop.f32.mrb[6].mxu1 }
 0x15f   : > { %v529_v61 = vrot.slane %v528_v27, 2  ;;  %v557_v63 = vrot.slane %v556_v31, 2  ;;  %v516_v2 = vmul.f32 %v481_v40, %v362_v32  ;;  %v524_v3 = vmul.f32 %v505_v60, %v362_v32  ;;  %v483_v0 = vpop.f32.mrb[7].mxu0  ;;  %v507_v4 = vpop.f32.mrb[7].mxu1 }
 0x160   : > { %v536_v5 = vrot.slane %v535_v58, 2  ;;  %v564_v6 = vrot.slane %v563_v59, 2  ;;  %v517_v7 = vmul.f32 %v483_v0, %v363_v35  ;;  %v525_v8 = vmul.f32 %v507_v4, %v363_v35 }
 0x161   : > { %v530_v9 = vadd.f32 %v529_v61, %v528_v27  ;;  %v558_v10 = vadd.f32 %v557_v63, %v556_v31  ;;  %v540_v11 = vadd.f32 %v516_v2, %v514_v51  ;;  %v568_v12 = vadd.f32 %v524_v3, %v522_v53 }
 0x162   : > { %v537_v13 = vadd.f32 %v536_v5, %v535_v58  ;;  %v565_v14 = vadd.f32 %v564_v6, %v563_v59  ;;  %v547_v15 = vadd.f32 %v517_v7, %v515_v30  ;;  %v575_v16 = vadd.f32 %v525_v8, %v523_v57 }
 0x163   : > { %v531_v17 = vrot.slane %v530_v9, 1  ;;  %v559_v18 = vrot.slane %v558_v10, 1  ;;  %v541_v19 = vrot.slane %v540_v11, 4  ;;  %v569_v20 = vrot.slane %v568_v12, 4 }
 0x164   : > { %v538_v21 = vrot.slane %v537_v13, 1  ;;  %v566_v22 = vrot.slane %v565_v14, 1  ;;  %v548_v24 = vrot.slane %v547_v15, 4  ;;  %v576_v54 = vrot.slane %v575_v16, 4 }
 0x165   : > { %v532_v25 = vadd.f32 %v531_v17, %v530_v9  ;;  %v560_v26 = vadd.f32 %v559_v18, %v558_v10  ;;  %v542_v28 = vadd.f32 %v541_v19, %v540_v11  ;;  %v570_v29 = vadd.f32 %v569_v20, %v568_v12 }
 0x166   : > { %v539_v32 = vadd.f32 %v538_v21, %v537_v13  ;;  %v567_v33 = vadd.f32 %v566_v22, %v565_v14  ;;  %v549_v34 = vadd.f32 %v548_v24, %v547_v15  ;;  %v577_v35 = vadd.f32 %v576_v54, %v575_v16 }
 0x167   : > { %v543_v36 = vrot.slane %v542_v28, 2  ;;  %v571_v37 = vrot.slane %v570_v29, 2 }
 0x168   : > { %v590_v38 = vcombine.low %v532_v25, %v539_v32  ;;  %v592_v62 = vcombine.low %v560_v26, %v567_v33  ;;  %v550_v39 = vrot.slane %v549_v34, 2  ;;  %v578_v41 = vrot.slane %v577_v35, 2 }
 0x169   : > { %v544_v42 = vadd.f32 %v543_v36, %v542_v28  ;;  %v572_v43 = vadd.f32 %v571_v37, %v570_v29 }
 0x16a   : > { %v551_v44 = vadd.f32 %v550_v39, %v549_v34  ;;  %v579_v45 = vadd.f32 %v578_v41, %v577_v35  ;;  %v599_v23 = vrot.slane %v592_v62, 6 }
 0x16b   : > { %v545_v46 = vrot.slane %v544_v42, 1  ;;  %v573_v47 = vrot.slane %v572_v43, 1 }
 0x16c   : > { %v552_v1 = vrot.slane %v551_v44, 1  ;;  %v580_v48 = vrot.slane %v579_v45, 1 }
 0x16d   : > { %v546_v49 = vadd.f32 %v545_v46, %v544_v42  ;;  %v574_v50 = vadd.f32 %v573_v47, %v572_v43 }
 0x16e   : > { %v553_v51 = vadd.f32 %v552_v1, %v551_v44  ;;  %v581_v52 = vadd.f32 %v580_v48, %v579_v45 }
 0x170   : > { %v591_v53 = vcombine.low %v546_v49, %v553_v51  ;;  %v593_v55 = vcombine.low %v574_v50, %v581_v52 }
 0x172   : > { %v594_v56 = vrot.slane %v591_v53, 7  ;;  %v604_v27 = vrot.slane %v593_v55, 5 }
 0x174   : > { %v596_v30 = vsel %vm595_vm9, %v594_v56, %v590_v38 }
 0x175   : > { %v598_v57 = vsel %vm597_vm10, %v594_v56, %v596_v30 }
 0x176   : > { %v601_v31 = vsel %vm600_vm11, %v599_v23, %v598_v57 }
 0x177   : > { %v603_v58 = vsel %vm602_vm12, %v599_v23, %v601_v31 }
 0x178   : > { %v606_v59 = vsel %vm605_vm13, %v604_v27, %v603_v58 }
 0x179   : > { %v608_v40 = vsel %vm607_vm14, %v604_v27, %v606_v59 }
 0x17a   : > { %610 = vst [vmem:[%s153_s7] sm:$0xff] %v608_v40 }
 0x17b   : > { %876 = shalt.err (!%p873_p8)
}
 0x17c   : > { %s877_s10 = scalar_lea.hbm %s1197_s16, 128  ;;  %s881_s18 = scalar_lea.hbm %s1248_s2, 256 }
 0x17d   : > { %p878_p7 = scmp.ne.s32.totalorder %s1197_s16, %s877_s10  ;;  %p882_p1 = scmp.lt.u32.totalorder %s1197_s16, %s1248_s2 }
 0x17e   : > { %p883_p4 = scmp.lt.u32.totalorder %s881_s18, %s877_s10  ;;  %p885_p11 = scmp.lt.u32.totalorder %s877_s10, %s1197_s16 }
 0x17f   : > { %p879_p10 = pnand %p878_p7, %p1256_p12 }
 0x180   : > { %p884_p6 = por %p883_p4, %p882_p1 }
 0x181   : > { %p880_p13 = pneg %p879_p10 }
 0x182   : > { %p886_p0 = por %p885_p11, %p884_p6 }
 0x184   : > { %p887_p3 = pnand %p886_p0, %p880_p13 }
 0x186   : > { %890 = shalt.err (!%p887_p3)
}
 0x187   : > { %759 = dma.vmem_to_hbm [thread:$0]  (%p1256_p12), %s1199_s8, 128, %s1197_s16, %s612_s17  }
 0x188 PF: > { %s640_s27 = sand.u32 1, %s927_s19   ;;  %p1257_p9 = scmp.ne.s32.totalorder %s1253_s5, 0 }
 0x189   : > { %p1258_p2 = scmp.ge.s32.totalorder %s947_s24, 2  ;;  %s641_s28 = scalar_lea.sflag [#allocation6], %s640_s27 }
 0x18b   : > { %p766_p5 = pnand %p1258_p2, %p1257_p9 }
 0x18d   : > { %922 = dma.done.wait (!%p766_p5), %s641_s28, 128  }
 0x18e   : > { %924 = vsyncadd (!%p766_p5), %s641_s28, 4294967168  ;;  %s22_s24 = sadd.s32 1, %s947_s24   ;;  %s1259_s19 = smov %s931_s20 }
 0x18f   : > { %p19_p8 = scmp.ge.s32.totalorder %s22_s24, 4   ;;  %s1260_s20 = smov %s935_s21 }
 0x190   : > { %s1261_s21 = smov %s1038_s4  ;;  %s1262_s22 = smov %s943_s23 }
 0x191   : > { %s1263_s23 = smov %s1265_s26  ;;  %21 = sbr.rel (!%p19_p8) target bundleno = 18 (0x12), region = 69 }
 0x198   :  { %646 = vsyncpa [#allocation5], 1 }
 0x199   :  { %648 = vsyncpa [#allocation5 + $0x1], 1 }
 0x19a   :  { %649 = vsyncpa [#allocation6], 1 }
 0x19b   :  { %651 = vsyncpa [#allocation6 + $0x1], 1 }

</bundles_post_ra>
